<compile_context>
chip_gen: v6e
topology: v6e:2x2x1
jax: 0.10.0
libtpu: 0.0.40
codegen_flags: <defaults>
</compile_context>

<pallas_src>
import functools

import numpy as np

import jax
import jax.numpy as jnp
from jax.experimental import pallas as pl
from jax.experimental.pallas import tpu as pltpu

EPS = 1e-4  # gckn/layers.py EPS


# ------------------------------------------------------------------ helpers ---

def _round_up(x, m):
    return (x + m - 1) // m * m


def _row_tile(dim, pref=512, align=8, split_for_cores=True):
    """Sublane-axis tile (multiple of `align`); >=2 tiles when possible (v7x: 2 TCs)."""
    d = _round_up(max(dim, 1), align)
    t = min(_round_up(pref, align), d)
    if split_for_cores and d >= 2 * align and d // t < 2:
        t = _round_up(-(-d // 2), align)
    return t, _round_up(dim, t)


def _col_tile(dim, pref=512):
    """Lane-axis tile (multiple of 128, or the full dim)."""
    d = _round_up(max(dim, 1), 128)
    t = min(pref, d)
    return t, _round_up(dim, t)


def _k_tile(dim, pref=512):
    """Contraction-axis tile: full dim when small, else a multiple of 128."""
    if dim <= pref:
        return dim, dim
    t = _round_up(pref, 128)
    return t, _round_up(dim, t)


def _vmem_limit(working_bytes):
    # Default scoped VMEM limit (16 MiB v5e, 32 MiB v6e/v7x) is plenty for a few-MiB working
    # set; only raise it when tiles actually need it and never above 48 MiB so v7x's
    # 64 MiB physical VMEM keeps headroom for Mosaic internal scratch.
    need = int(2 * working_bytes)
    if need <= 16 << 20:
        return None
    return min(need, 48 << 20)


# ------------------------------------------------------------------ kernels ---

def _matmul_kernel(a_ref, b_ref, o_ref):
    # f32 output accumulated in place: the output BlockSpec ignores k, so the block stays
    # VMEM-resident across the K axis (no acc scratch, no extra copy).
    @pl.when(pl.program_id(2) == 0)
    def _():
        o_ref[...] = jnp.zeros_like(o_ref)

    o_ref[...] += jnp.dot(a_ref[...], b_ref[...],
                          preferred_element_type=jnp.float32)


def pallas_matmul_f32(a, b, *, tm=512, tn=512, tk=512):
    """(M,K)@(K,N) -> padded f32 result (caller slices once at the very end)."""
    M, K = a.shape
    K2, N = b.shape
    assert K == K2
    row_align = 16 if a.dtype == jnp.bfloat16 else 8
    tm, Mp = _row_tile(M, tm, align=row_align)
    tn, Np = _col_tile(N, tn)
    tk, Kp = _k_tile(K, tk)
    if (Mp, Kp) != (M, K):
        a = jnp.pad(a, ((0, Mp - M), (0, Kp - K)))
    if (Kp, Np) != (K, N):
        b = jnp.pad(b, ((0, Kp - K), (0, Np - N)))

    itemsize = jnp.dtype(a.dtype).itemsize
    working = 3 * (tm * tk + tk * tn) * itemsize + 3 * tm * tn * 4

    return pl.pallas_call(
        _matmul_kernel,
        out_shape=jax.ShapeDtypeStruct((Mp, Np), jnp.float32),
        grid_spec=pltpu.PrefetchScalarGridSpec(
            num_scalar_prefetch=0,
            grid=(Mp // tm, Np // tn, Kp // tk),
            in_specs=[
                pl.BlockSpec((tm, tk), lambda i, j, k: (i, k)),
                pl.BlockSpec((tk, tn), lambda i, j, k: (k, j)),
            ],
            out_specs=pl.BlockSpec((tm, tn), lambda i, j, k: (i, j)),
        ),
        compiler_params=pltpu.CompilerParams(
            dimension_semantics=("parallel", "parallel", "arbitrary"),
            vmem_limit_bytes=_vmem_limit(working),
        ),
    )(a, b)


def _pool_kernel(base_ref, blen_ref, lo_ref, hi_ref, scale_ref, x_ref, lt_ref,
                 o_ref, acc_ref, *, alpha, tk, mxu_dtype):
    """Fused kappa + banded segment pooling + norm/count scale + lintrans epilogue."""
    i = pl.program_id(0)
    k = pl.program_id(1)

    @pl.when(k == 0)
    def _():
        acc_ref[...] = jnp.zeros_like(acc_ref)

    @pl.when(k < blen_ref[i])            # skip K tiles outside this node tile's band
    def _():
        # kappa in f32 on the EUP; each path tile is consumed by (at most) one node tile,
        # so there is no redundant recompute across M tiles.
        kx = jnp.exp(alpha * (x_ref[...].astype(jnp.float32) - 1.0))
        # Exact 0/1 membership mask built from per-node path offsets (no HBM mask, padded
        # path rows excluded because path_id >= hi for every node row).
        p0 = (base_ref[i] + k) * tk
        path_ids = p0 + jax.lax.broadcasted_iota(
            jnp.int32, (acc_ref.shape[0], tk), 1)
        mask = ((path_ids >= lo_ref[...]) & (path_ids < hi_ref[...])).astype(mxu_dtype)
        acc_ref[...] += jnp.dot(mask, kx.astype(mxu_dtype),
                                preferred_element_type=jnp.float32)

    @pl.when(k == pl.num_programs(1) - 1)
    def _():
        # Epilogue: node norms (and 1/count for 'mean') in f32, then the fused lintrans
        # matmul, so the pooled (n_nodes, H) array never round-trips HBM un-transformed.
        pooled = scale_ref[...] * acc_ref[...]
        o_ref[...] = jnp.dot(pooled.astype(mxu_dtype), lt_ref[...],
                             preferred_element_type=jnp.float32).astype(o_ref.dtype)


def pallas_path_pool(embed, lo, hi, scale, lintrans_t, base_blk, band_len,
                     *, alpha, tm, tk, max_band, mxu_dtype):
    Kp, Hp = embed.shape
    Mp = lo.shape[0]

    def x_map(i, k, base, blen):
        # Clamp so skipped iterations re-use the previous block index (no wasted DMA).
        kk = jnp.minimum(k, jnp.maximum(blen[i] - 1, 0))
        return (base[i] + kk, 0)

    def row_map(i, k, base, blen):
        return (i, 0)

    e_item = jnp.dtype(embed.dtype).itemsize
    l_item = jnp.dtype(lintrans_t.dtype).itemsize
    working = 3 * tk * Hp * e_item + 2 * Hp * Hp * l_item + 4 * tm * Hp * 4

    return pl.pallas_call(
        functools.partial(_pool_kernel, alpha=alpha, tk=tk, mxu_dtype=mxu_dtype),
        out_shape=jax.ShapeDtypeStruct((Mp, Hp), jnp.float32),
        grid_spec=pltpu.PrefetchScalarGridSpec(
            num_scalar_prefetch=2,                       # base_blk, band_len (SMEM)
            grid=(Mp // tm, max_band),
            in_specs=[
                pl.BlockSpec((tm, 1), row_map),          # lo  (first path id per node)
                pl.BlockSpec((tm, 1), row_map),          # hi  (one-past-last path id)
                pl.BlockSpec((tm, 1), row_map),          # scale = norm (/count), 0 on padding
                pl.BlockSpec((tk, Hp), x_map),           # embed band tile (data-dependent)
                pl.BlockSpec((Hp, Hp), lambda i, k, b, l: (0, 0)),   # lintrans^T, resident
            ],
            out_specs=pl.BlockSpec((tm, Hp), row_map),
            scratch_shapes=[pltpu.VMEM((tm, Hp), jnp.float32)],
        ),
        compiler_params=pltpu.CompilerParams(
            dimension_semantics=("parallel", "arbitrary"),
            vmem_limit_bytes=_vmem_limit(working),
        ),
    )(base_blk, band_len, lo, hi, scale, embed, lintrans_t)


# ------------------------------------------------------------------ wrapper ---

def path_layer_forward(features, paths_indices, n_paths_per_node, weight,
                       *, kernel_args=(0.5,), pooling="mean", use_bf16=False,
                       tile_m=512, tile_n=512, tile_k=512):
    """
    features:         (n_nodes, input_size)  f32
    paths_indices:    (n_paths, path_size)   int32, values < n_nodes, grouped per start node
    n_paths_per_node: (n_nodes,)             int32 (paths per node, in order)
    weight:           (path_size, hidden_size, input_size)
    returns:          (n_nodes, 1, hidden_size)
    NOTE: grid/band construction needs concrete path counts (host side), like the
          precomputed `other_info` of the PyTorch module; do not jit this wrapper.
    """
    if features.ndim != 2:
        # TODO(synk): aggregation branch / 3-D and 4-D features are not implemented.
        raise NotImplementedError("only 2-D node features (non-aggregation branch)")
    n_nodes, input_size = features.shape
    path_size, hidden_size, _ = weight.shape
    n_paths = paths_indices.shape[0]
    alpha = 1.0 / float(kernel_args[0]) ** 2          # 'exp' kernel: kappa(x)=exp(alpha*(x-1))
    mxu_dtype = jnp.bfloat16 if use_bf16 else jnp.float32

    # ---- band / grid structure (host side, from the path counts) -------------------
    counts = np.asarray(jax.device_get(n_paths_per_node), dtype=np.int64)
    offsets = np.concatenate([np.zeros(1, np.int64), np.cumsum(counts)])
    assert int(offsets[-1]) == n_paths

    tm, Mp = _row_tile(n_nodes, tile_m, align=8)       # node tiles (pool kernel rows)
    Hp = _round_up(hidden_size, 128)                   # lane-dense hidden size
    tk_p = min(_round_up(tile_k, 128), _round_up(n_paths, 128))   # path tile
    Kp = _round_up(n_paths, tk_p)
    n_kblk = Kp // tk_p
    n_mt = Mp // tm

    lo_t = offsets[np.minimum(np.arange(n_mt) * tm, n_nodes)]
    hi_t = offsets[np.minimum((np.arange(n_mt) + 1) * tm, n_nodes)]
    base_blk = np.minimum(lo_t // tk_p, n_kblk - 1).astype(np.int32)
    band_len = ((-(-hi_t // tk_p)) - lo_t // tk_p).astype(np.int32)
    max_band = int(max(1, band_len.max()))

    lo = np.zeros((Mp, 1), np.int32)
    hi = np.zeros((Mp, 1), np.int32)
    lo[:n_nodes, 0] = offsets[:-1]
    hi[:n_nodes, 0] = offsets[1:]

    # ---- normalize_() + node norms (cheap elementwise glue) -------------------------
    w = weight / jnp.maximum(jnp.linalg.norm(weight, axis=-1, keepdims=True), EPS)
    norms = jnp.linalg.norm(features, axis=-1, keepdims=True)          # (n_nodes, 1)
    fnorm = features / jnp.maximum(norms, EPS)

    # Per-node epilogue scale (f32, applied after the pooled sum -> same order as torch ref).
    if pooling == "mean":
        scale_v = norms[:, 0] / jnp.maximum(n_paths_per_node.astype(jnp.float32), 1.0)
    elif pooling == "sum":
        scale_v = norms[:, 0]
    else:
        # TODO(synk): 'max' path pooling needs a masked segment-max kernel, not a matmul.
        raise NotImplementedError(f"pooling={pooling!r}")
    scale = jnp.zeros((Mp, 1), jnp.float32).at[:n_nodes, 0].set(scale_v)

    # ---- projection onto all path_size filter banks: one lane-dense MXU matmul ------
    # Each bank's H is padded to Hp so the reshape to (n, P, Hp) stays lane-dense and
    # padded columns are exactly zero.
    w_pad = jnp.pad(w, ((0, 0), (0, Hp - hidden_size), (0, 0)))        # (P, Hp, I)
    w_cat_t = w_pad.reshape(path_size * Hp, input_size).T              # (I, P*Hp)
    proj = pallas_matmul_f32(fnorm.astype(mxu_dtype), w_cat_t.astype(mxu_dtype),
                             tm=tile_m, tn=tile_n, tk=tile_k)          # (>=n_nodes, P*Hp) f32
    proj = proj.reshape(proj.shape[0], path_size, Hp)

    # ---- path_conv gather + mean ------------------------------------------------------
    # TODO(synk): fusing this data-dependent row gather into Pallas needs a DMA-gather
    # (scalar-prefetched indices + manual async copies); kept as XLA glue, but structured
    # as path_size accumulating gathers so the (n_paths, P, Hp) intermediate is never
    # materialised.
    pidx = jnp.asarray(paths_indices, dtype=jnp.int32)
    if Kp != n_paths:
        pidx = jnp.pad(pidx, ((0, Kp - n_paths), (0, 0)))   # padded paths -> node 0; masked in-kernel
    embed = proj[pidx[:, 0], 0, :]
    for j in range(1, path_size):
        embed = embed + proj[pidx[:, j], j, :]
    embed = (embed * (1.0 / path_size)).astype(mxu_dtype)              # (Kp, Hp)

    # ---- lintrans = matrix_inverse_sqrt(kappa(mean_j W_j W_j^T)) (tiny, plain jnp) ----
    w_h = jnp.transpose(w, (1, 0, 2)).reshape(hidden_size, path_size * input_size)
    gram = (w_h @ w_h.T) / path_size                                   # (H, H), tiny
    kgram = jnp.exp(alpha * (gram - 1.0))
    # TODO(synk): matrix inverse sqrt needs an eigendecomposition; no Pallas eigh, so it
    # stays on the tiny (H, H) matrix in plain jnp.
    e, v = jnp.linalg.eigh(kgram)
    e_rsqrt = 1.0 / (jnp.sqrt(jnp.maximum(e, 0.0)) + 1e-2)
    lintrans = (v * e_rsqrt[None, :]) @ v.T
    # Zero rows of the padded lintrans annihilate the kappa(0)=exp(-alpha) garbage that
    # padded embed columns produce; zero columns keep padded output lanes at 0.
    lt_pad = jnp.zeros((Hp, Hp), jnp.float32).at[:hidden_size, :hidden_size].set(lintrans.T)
    lt_pad = lt_pad.astype(mxu_dtype)

    # ---- fused kappa + banded segment pooling + norm scale + lintrans epilogue -------
    out_pad = pallas_path_pool(
        embed, jnp.asarray(lo), jnp.asarray(hi), scale, lt_pad,
        jnp.asarray(base_blk), jnp.asarray(band_len),
        alpha=alpha, tm=tm, tk=tk_p, max_band=max_band, mxu_dtype=mxu_dtype)

    out = out_pad[:n_nodes, :hidden_size]              # single slice at the very end
    return out.reshape(n_nodes, 1, hidden_size)


# ---------------------------------------------------------------- reference ---

def _reference_forward(features, paths_indices, n_paths_per_node, weight,
                       *, kernel_args=(0.5,), pooling="mean"):
    n_nodes, _ = features.shape
    path_size, hidden_size, _ = weight.shape
    alpha = 1.0 / float(kernel_args[0]) ** 2
    w = weight / jnp.maximum(jnp.linalg.norm(weight, axis=-1, keepdims=True), EPS)
    norms = jnp.linalg.norm(features, axis=-1, keepdims=True)
    fnorm = features / jnp.maximum(norms, EPS)
    proj = jnp.einsum("ni,phi->nph", fnorm, w)
    gathered = proj[paths_indices, jnp.arange(path_size)[None, :], :]
    embed = gathered.mean(axis=1)
    kx = jnp.exp(alpha * (embed - 1.0))
    offsets = jnp.cumsum(n_paths_per_node)
    seg = jnp.searchsorted(offsets, jnp.arange(paths_indices.shape[0]), side="right")
    pooled = jax.ops.segment_sum(kx, seg, num_segments=n_nodes)
    if pooling == "mean":
        pooled = pooled / jnp.maximum(n_paths_per_node.astype(kx.dtype), 1.0)[:, None]
    scaled = norms * pooled
    gram = jnp.einsum("phi,pgi->hg", w, w) / path_size
    kgram = jnp.exp(alpha * (gram - 1.0))
    e, v = jnp.linalg.eigh(kgram)
    e_rsqrt = 1.0 / (jnp.sqrt(jnp.maximum(e, 0.0)) + 1e-2)
    lintrans = (v * e_rsqrt[None, :]) @ v.T
    out = scaled @ lintrans.T
    return out.reshape(n_nodes, 1, hidden_size)


# --------------------------------------------------------------------- main ---

if __name__ == "__main__":
    # Same matmul precision for the XLA glue in both the Pallas pipeline and the reference.
    jax.config.update("jax_default_matmul_precision", "highest")

    key = jax.random.PRNGKey(0)
    k1, k2, k3 = jax.random.split(key, 3)

    n_nodes, input_size, hidden_size, path_size = 16, 8, 32, 3
    n_paths_per_node = jnp.array([3, 2, 4, 1, 3, 2, 2, 3, 1, 4, 2, 3, 2, 3, 2, 3],
                                 dtype=jnp.int32)
    n_paths = int(jnp.sum(n_paths_per_node))            # 40

    features = jax.random.normal(k1, (n_nodes, input_size), dtype=jnp.float32)
    weight = 0.2 * jax.random.normal(k2, (path_size, hidden_size, input_size),
                                     dtype=jnp.float32)

    # Paths grouped per start node: first column is the start node, rest random.
    start = jnp.repeat(jnp.arange(n_nodes, dtype=jnp.int32), n_paths_per_node,
                       total_repeat_length=n_paths)
    rest = jax.random.randint(k3, (n_paths, path_size - 1), 0, n_nodes,
                              dtype=jnp.int32)
    paths_indices = jnp.concatenate([start[:, None], rest], axis=1)

    ref = _reference_forward(features, paths_indices, n_paths_per_node, weight,
                             kernel_args=(0.5,), pooling="mean")

    # f32 MXU operands: tight check against the pure-JAX reference.
    out = path_layer_forward(features, paths_indices, n_paths_per_node, weight,
                             kernel_args=(0.5,), pooling="mean", use_bf16=False)
    jax.block_until_ready(out)
    assert out.shape == (n_nodes, 1, hidden_size)
    err_f32 = float(jnp.max(jnp.abs(out - ref)))
    assert jnp.allclose(out, ref, atol=1e-3, rtol=1e-3), f"f32 max_err={err_f32}"

    # bf16 MXU operands (the fast path on v5e/v6e/v7x): f32 accumulation, looser tolerance.
    out_bf16 = path_layer_forward(features, paths_indices, n_paths_per_node, weight,
                                  kernel_args=(0.5,), pooling="mean", use_bf16=True)
    jax.block_until_ready(out_bf16)
    err_bf16 = float(jnp.max(jnp.abs(out_bf16 - ref)))
    assert jnp.allclose(out_bf16, ref, atol=3e-2, rtol=3e-2), f"bf16 max_err={err_bf16}"

    print("KERNEL_OK")
</pallas_src>

<mosaic_0001>
module attributes {stable_mosaic.version = 11 : i64} {
  func.func @_matmul_kernel(%arg0: i32, %arg1: i32, %arg2: i32, %arg3: memref<8x8xf32, #tpu.memory_space<vmem>>, %arg4: memref<8x384xf32, #tpu.memory_space<vmem>>, %arg5: memref<8x384xf32, #tpu.memory_space<vmem>>) attributes {dimension_semantics = [#tpu.dimension_semantics<parallel>, #tpu.dimension_semantics<parallel>, #tpu.dimension_semantics<arbitrary>], iteration_bounds = array<i64: 2, 1, 1>, scalar_prefetch = 0 : i64, scratch_operands = 0 : i64, tpu.core_type = #tpu.core_type<tc>, window_params = [{transform_indices = @transform_0, window_bounds = array<i64: 8, 8>}, {transform_indices = @transform_1, window_bounds = array<i64: 8, 384>}, {transform_indices = @transform_2, window_bounds = array<i64: 8, 384>}]} {
    %c0_i32 = arith.constant 0 : i32
    %0 = arith.cmpi eq, %arg2, %c0_i32 : i32
    %1 = arith.extui %0 : i1 to i32
    %c0_i32_0 = arith.constant 0 : i32
    %2 = arith.cmpi ne, %1, %c0_i32_0 : i32
    scf.if %2 {
      %cst_8 = arith.constant 0.000000e+00 : f32
      %9 = vector.broadcast %cst_8 : f32 to vector<8x384xf32>
      %c0_9 = arith.constant 0 : index
      %c0_10 = arith.constant 0 : index
      %10 = vector.load %arg5[%c0_9, %c0_10] : memref<8x384xf32, #tpu.memory_space<vmem>>, vector<8x384xf32>
      tpu.vector_store %arg5[%c0_9, %c0_10], %9 {strides = array<i32>} : memref<8x384xf32, #tpu.memory_space<vmem>>, vector<8x384xf32>,
    } else {
    }
    %c0 = arith.constant 0 : index
    %c0_1 = arith.constant 0 : index
    %3 = vector.load %arg5[%c0, %c0_1] : memref<8x384xf32, #tpu.memory_space<vmem>>, vector<8x384xf32>
    %c0_2 = arith.constant 0 : index
    %c0_3 = arith.constant 0 : index
    %4 = vector.load %arg3[%c0_2, %c0_3] : memref<8x8xf32, #tpu.memory_space<vmem>>, vector<8x8xf32>
    %c0_4 = arith.constant 0 : index
    %c0_5 = arith.constant 0 : index
    %5 = vector.load %arg4[%c0_4, %c0_5] : memref<8x384xf32, #tpu.memory_space<vmem>>, vector<8x384xf32>
    %cst = arith.constant dense<0.000000e+00> : vector<8x384xf32>
    %6 = tpu.matmul %4, %5, %cst {dimension_numbers = #tpu.dot_dimension_numbers<[1], [0], [0], [1], [0, 0, 1, 1], [], []>, precision = #tpu.contract_precision<fp32>} : vector<8x8xf32>, vector<8x384xf32>, vector<8x384xf32> -> vector<8x384xf32>
    %7 = arith.addf %3, %6 : vector<8x384xf32>
    %c0_6 = arith.constant 0 : index
    %c0_7 = arith.constant 0 : index
    %8 = vector.load %arg5[%c0_6, %c0_7] : memref<8x384xf32, #tpu.memory_space<vmem>>, vector<8x384xf32>
    tpu.vector_store %arg5[%c0_6, %c0_7], %7 {strides = array<i32>} : memref<8x384xf32, #tpu.memory_space<vmem>>, vector<8x384xf32>,
    return
  }
  func.func @transform_0(%arg0: i32, %arg1: i32, %arg2: i32) -> (i32, i32) {
    %c0_i32 = arith.constant 0 : i32
    return %arg0, %arg2 : i32, i32
  }
  func.func @transform_1(%arg0: i32, %arg1: i32, %arg2: i32) -> (i32, i32) {
    %c0_i32 = arith.constant 0 : i32
    return %arg2, %arg1 : i32, i32
  }
  func.func @transform_2(%arg0: i32, %arg1: i32, %arg2: i32) -> (i32, i32) {
    %c0_i32 = arith.constant 0 : i32
    return %arg0, %arg1 : i32, i32
  }
}

</mosaic_0001>

<bundles_post_ra>
// kernel: tpu_custom_call.1
= control target key start
LH: loop header
LB: loop body
LE: loop exit
PB: predicated region body
PF: predicated region fallthrough
CT: control target
= control target key end

     0   :  { %7 = vsyncpa [#allocation3], 0  ;;  %s1600_s0 = inlined_call_operand.vmem [shape: f32[16,8], index: 0, kind: input, shape index: {}]   ;;  %s1601_s1 = inlined_call_operand.vmem [shape: f32[8,384], index: 1, kind: input, shape index: {}]   ;;  %s1602_s2 = inlined_call_operand.hbm [shape: f32[16,384], index: 2, kind: output, shape index: {}]  }
   0x1   :  { %9 = vsyncpa [#allocation3 + $0x1], 0  ;;  %s1464_s9 = smov 0   ;;  %s1466_s10 = smov 0  }
   0x2   :  { %s1468_s11 = smov 0   ;;  %s1470_s12 = smov 0  }
   0x3   :  { %s1472_s13 = smov 0   ;;  %s1474_s14 = smov 0  }
   0x4 LB: > { %s1257_s15 = sadd.s32 4294967295, %s1444_s14   ;;  %s1258_s16 = sadd.s32 4294967294, %s1444_s14   ;;  %s1444_s14 = sphi %s1474_s14, %s15_s14   ;;  %s1440_s13 = sphi %s1472_s13, %s1609_s13   ;;  %s1436_s12 = sphi %s1470_s12, %s1608_s12   ;;  %s1432_s11 = sphi %s1468_s11, %s1607_s11   ;;  %s1428_s10 = sphi %s1466_s10, %s1606_s10   ;;  %s1424_s9 = sphi %s1464_s9, %s1605_s9  }
   0x5   : > { %s34_s17 = sadd.s32 1, %s1440_s13  ;;  %s99_s18 = sadd.s32 1, %s1432_s11 }
   0x6   : > { %p36_p0 = scmp.ge.s32.totalorder %s34_s17, 2  ;;  %p109_p1 = scmp.ne.s32.totalorder %s1432_s11, %s1428_s10 }
   0x7   : > { %p110_p2 = scmp.eq.s32.totalorder %s1257_s15, 1  ;;  %p115_p3 = scmp.ne.s32.totalorder %s1428_s10, %s1424_s9 }
   0x8   : > { %s1611_s17 = smov (%p36_p0, %s34_s17), 0  ;;  %p116_p5 = scmp.eq.s32.totalorder %s1258_s16, 1 }
   0x9   : > { %p1504_p4 = por %p110_p2, %p109_p1  ;;  %s94_s20 = ssub.s32 %s1440_s13, %s1611_s17 }
   0xa   : > { %p1262_p6 = scmp.ge.s32.totalorder %s1444_s14, 1  ;;  %p97_p7 = scmp.eq.s32.totalorder %s94_s20, 0 }
   0xb   : > { %p1511_p8 = por %p116_p5, %p115_p3  ;;  %p157_p9 = scmp.lt.s32.totalorder %s1444_s14, 3 }
   0xc   : > { %s1517_s22 = scalar_select %p97_p7, %s1432_s11, %s99_s18  }
   0xd   : > { %p158_p10 = pnand %p1262_p6, %p157_p9 }
   0xe   : > { %p190_p11 = scmp.lt.s32.totalorder (!%p158_p10), %s1436_s12, 1  ;;  %s187_s6 = sand.u32 (!%p158_p10), 1, %s1428_s10  }
   0xf   : > { %161 = sbr.rel (%p158_p10) target bundleno = 266 (0x10a), region = 28  ;;  %s1144_s24 = scalar_lea.sflag (!%p158_p10), [#allocation3], %s187_s6 }
  0x10   : > { %s1309_s7 = smul.u32 (!%p158_p10), 24, %s187_s6  ;;  %s1448_s26 = smov (!%p158_p10), [#allocation2]  }
  0x11   : > { %s1310_s15 = smul.u32 (!%p158_p10), 384, %s1436_s12  ;;  %s1372_s27 = sshll.u32 (!%p158_p10), %s1448_s26, 4  ;;  %s1373_s27 = int_to_ptr.vmem [resolvable:$false] %s1372_s27 }
  0x12   : > { %s189_s8 = scalar_lea.vmem (!%p158_p10), [#allocation2], %s1309_s7 }
  0x13   : > { %s1160_s16 = sshll.u32 (!%p158_p10), %s189_s8, 4  ;;  %s1158_s23 = scalar_lea.hbm (!%p158_p10), %s1602_s2, %s1310_s15  ;;  %s1161_s16 = int_to_ptr.vmem [resolvable:$true] %s1160_s16 }
  0x14   : > { %v220_v0 = vld [vmem:[%s1601_s1 + $0x8] sm:$0xff]  ;;  %v219_v1 = vld [vmem:[%s1601_s1] sm:$0xff]  ;;  %v221_v2 = vld [vmem:[%s1601_s1 + $0x10] sm:$0xff]  ;;  %v1446_v5 = vmov 0.0   ;;  %s191_s29 = scalar_select %p190_p11, %s1436_s12, 1  ;;  %vm222_vm0 = vcmask 64512  }
  0x15   : > { %v256_v3 = vand.u32 4294901760, %v220_v0  ;;  %v258_v4 = vand.u32 4294901760, %v219_v1  ;;  %292 = vmatprep.mubr.f32.mxu0 %v1446_v5  ;;  %378 = vmatprep.mubr.f32.mxu1 %v1446_v5  ;;  %v722_v6 = vand.u32 4294901760, %v221_v2  ;;  %vm1447_vm1 = vmmov 0   ;;  %s1368_s25 = scalar_lea.vmem %s1161_s16, 384  ;;  %s1374_s12 = scalar_lea.vmem %s1373_s27, 768 }
  0x16   : > { %s1263_s30 = sshll.u32 %s191_s29, 3  ;;  %p1369_p12 = scmp.ne.s32.totalorder %s1161_s16, %s1368_s25 }
  0x17   : > { %257 = vmatprep.subr.mxu0 %v256_v3  ;;  %v335_v7 = vsub.f32 %v220_v0, %v256_v3  ;;  %v341_v8 = vsub.f32 %v219_v1, %v258_v4  ;;  %s196_s5 = scalar_lea.vmem %s1600_s0, %s1263_s30  ;;  %v799_v12 = vsub.f32 %v221_v2, %v722_v6  ;;  %p1375_p1 = scmp.lt.s32.totalorder %s1161_s16, %s1373_s27 }
  0x18   : > { %259 = vmatpush1.msra.mxu0 %v258_v4  ;;  %v218_v11 = vld [vmem:[%s196_s5] sm:$0xff]  ;;  %p1370_p13 = pnand %p1369_p12, %p1504_p4  ;;  %p1376_p2 = scmp.lt.s32.totalorder %s1374_s12, %s1368_s25 }
  0x19   : > { %v336_v9 = vand.u32 4294901760, %v335_v7  ;;  %v342_v10 = vand.u32 4294901760, %v341_v8  ;;  %418 = vmatprep.subr.mxu0 %v335_v7  ;;  %v224_v15 = vsel %vm222_vm0, %v218_v11, 0  ;;  %v800_v20 = vand.u32 4294901760, %v799_v12 }
  0x1a   : > { %v293_v16 = vand.u32 4294901760, %v224_v15  ;;  %p1371_p0 = pneg %p1370_p13  ;;  %p1377_p3 = por %p1376_p2, %p1375_p1 }
  0x1b   : > { %v337_v13 = vsub.f32 %v335_v7, %v336_v9  ;;  %v343_v14 = vsub.f32 %v341_v8, %v342_v10  ;;  %v801_v23 = vsub.f32 %v799_v12, %v800_v20 }
  0x1c   : > { %v294_v19 = vsub.f32 %v224_v15, %v293_v16  ;;  %p1378_p5 = pnand %p1377_p3, %p1371_p0 }
  0x1d   : > { %v338_v17 = vand.u32 4294901760, %v337_v13  ;;  %v344_v18 = vand.u32 4294901760, %v343_v14  ;;  %v802_v25 = vand.u32 4294901760, %v801_v23 }
  0x1e   : > { %v295_v21 = vand.u32 4294901760, %v294_v19 }
  0x1f   : > { %339 = vmatprep.subr.mxu1 %v338_v17 }
  0x20   : > { %345 = vmatpush1.msra.mxu1 %v344_v18  ;;  %v296_v22 = vsub.f32 %v294_v19, %v295_v21 }
  0x21   : > { %380 = vmatmul.mubr.f32.vlgmr.msra.gmra.mxu1 %v293_v16  ;;  %494 = vmatprep.subr.mxu1 %v256_v3 }
  0x22   : > { %496 = vmatpush1.msra.mxu1 %v258_v4  ;;  %529 = vmatprep.mubr.f32.mxu1 %v1446_v5  ;;  %v297_v24 = vand.u32 4294901760, %v296_v22 }
  0x23   : > { %648 = vmatprep.subr.mxu1 %v256_v3 }
  0x24   : > { %298 = vmatmul.mubr.f32.vlgmr.msra.gmra.mxu0 %v297_v24 }
  0x25   : > { %533 = vmatmul.mubr.f32.vlgmr.msra.gmra.mxu1 %v295_v21  ;;  %421 = vmatpush1.msra.mxu0 %v341_v8 }
  0x26   : > { %650 = vmatpush1.msra.mxu1 %v258_v4  ;;  %454 = vmatprep.mubr.f32.mxu0 %v1446_v5 }
  0x27   : > { %572 = vmatprep.subr.mxu0 %v336_v9  ;;  %683 = vmatprep.mubr.f32.mxu1 %v1446_v5 }
  0x28   : > { %1284 = vmatprep.subr.mxu1 %v1446_v5  ;;  %457 = vmatmul.mubr.f32.vlgmr.msra.gmra.mxu0 %v294_v19 }
  0x29   : > { %685 = vmatmul.mubr.f32.vlgmr.msra.gmra.mxu1 %v293_v16  ;;  %576 = vmatpush1.msra.mxu0 %v342_v10 }
  0x2a   : > { %1285 = vmatpush3.msra.mxu1 %v802_v25  ;;  %609 = vmatprep.mubr.f32.mxu0 %v1446_v5 }
  0x2b   : > { %1279 = vmatprep.subr.mxu0 %v1446_v5  ;;  %1286 = vmatprep.mubr.msk.f32.mxu1 %vm1447_vm1, %v1446_v5 }
  0x2c   : > { %1294 = vmatprep.subr.mxu1 %v1446_v5  ;;  %611 = vmatmul.mubr.f32.vlgmr.msra.gmra.mxu0 %v293_v16 }
  0x2d   : > { %1287 = vmatmul.mubr.f32.vlgmr.msra.gmra.mxu1 %v293_v16  ;;  %1280 = vmatpush3.msra.mxu0 %v722_v6 }
  0x2e   : > { %1295 = vmatpush3.msra.mxu1 %v722_v6  ;;  %1281 = vmatprep.mubr.msk.f32.mxu0 %vm1447_vm1, %v1446_v5 }
  0x2f   : > { %1289 = vmatprep.subr.mxu0 %v1446_v5  ;;  %1296 = vmatprep.mubr.msk.f32.mxu1 %vm1447_vm1, %v1446_v5 }
  0x30   : > { %1304 = vmatprep.subr.mxu1 %v1446_v5  ;;  %1282 = vmatmul.mubr.f32.vlgmr.msra.gmra.mxu0 %v297_v24 }
  0x31   : > { %1297 = vmatmul.mubr.f32.vlgmr.msra.gmra.mxu1 %v295_v21  ;;  %1290 = vmatpush3.msra.mxu0 %v799_v12 }
  0x32   : > { %1305 = vmatpush3.msra.mxu1 %v722_v6  ;;  %1291 = vmatprep.mubr.msk.f32.mxu0 %vm1447_vm1, %v1446_v5 }
  0x33   : > { %1299 = vmatprep.subr.mxu0 %v1446_v5  ;;  %1306 = vmatprep.mubr.msk.f32.mxu1 %vm1447_vm1, %v1446_v5 }
  0x34   : > { %1292 = vmatmul.mubr.f32.vlgmr.msra.gmra.mxu0 %v294_v19 }
  0x35   : > { %1307 = vmatmul.mubr.f32.vlgmr.msra.gmra.mxu1 %v293_v16  ;;  %1300 = vmatpush3.msra.mxu0 %v800_v20 }
  0x36   : > { %1301 = vmatprep.mubr.msk.f32.mxu0 %vm1447_vm1, %v1446_v5 }
  0x38   : > { %1302 = vmatmul.mubr.f32.vlgmr.msra.gmra.mxu0 %v293_v16 }
  0xe1   : > { %v381_v26 = vpop.f32.mrf.mxu1 }
  0xe3   : > { %v383_v27 = vpop.f32.mrf.mxu1 }
  0xe4   : > { %v299_v29 = vpop.f32.mrf.mxu0 }
  0xe5   : > { %v534_v28 = vpop.f32.mrf.mxu1  ;;  %v382_v32 = vadd.f32 %v381_v26, %v299_v29 }
  0xe6   : > { %v301_v31 = vpop.f32.mrf.mxu0 }
  0xe7   : > { %v536_v30 = vpop.f32.mrf.mxu1  ;;  %v384_v35 = vadd.f32 %v383_v27, %v301_v31 }
  0xe8   : > { %v458_v34 = vpop.f32.mrf.mxu0 }
  0xe9   : > { %v686_v33 = vpop.f32.mrf.mxu1  ;;  %v459_v36 = vadd.f32 %v458_v34, %v382_v32 }
  0xea   : > { %v460_v38 = vpop.f32.mrf.mxu0 }
  0xeb   : > { %v688_v37 = vpop.f32.mrf.mxu1  ;;  %v535_v39 = vadd.f32 %v534_v28, %v459_v36  ;;  %v461_v40 = vadd.f32 %v460_v38, %v384_v35 }
  0xec   : > { %v612_v42 = vpop.f32.mrf.mxu0 }
  0xed   : > { %v839_v41 = vpop.f32.mrf.mxu1  ;;  %v537_v43 = vadd.f32 %v536_v30, %v461_v40  ;;  %v613_v44 = vadd.f32 %v612_v42, %v535_v39 }
  0xee   : > { %v614_v46 = vpop.f32.mrf.mxu0 }
  0xef   : > { %v1288_v45 = vpop.f32.mrf.mxu1  ;;  %v687_v47 = vadd.f32 %v686_v33, %v613_v44  ;;  %v615_v48 = vadd.f32 %v614_v46, %v537_v43 }
  0xf0   : > { %v763_v50 = vpop.f32.mrf.mxu0 }
  0xf1   : > { %v987_v49 = vpop.f32.mrf.mxu1  ;;  %v689_v51 = vadd.f32 %v688_v37, %v615_v48  ;;  %1140 = vst [vmem:[%s189_s8] sm:$0xff] %v687_v47  ;;  %v840_v54 = vadd.f32 %v839_v41, %v763_v50 }
  0xf2   : > { %v1283_v53 = vpop.f32.mrf.mxu0 }
  0xf3   : > { %v1298_v52 = vpop.f32.mrf.mxu1  ;;  %1141 = vst [vmem:[%s189_s8 + $0x8] sm:$0xff] %v689_v51 }
  0xf4   : > { %v913_v56 = vpop.f32.mrf.mxu0 }
  0xf5   : > { %v1133_v55 = vpop.f32.mrf.mxu1  ;;  %v914_v57 = vadd.f32 %v913_v56, %v840_v54 }
  0xf6   : > { %v1293_v59 = vpop.f32.mrf.mxu0 }
  0xf7   : > { %v1308_v58 = vpop.f32.mrf.mxu1  ;;  %v988_v60 = vadd.f32 %v987_v49, %v914_v57 }
  0xf8   : > { %v1061_v61 = vpop.f32.mrf.mxu0 }
  0xf9   : > { %v1062_v62 = vadd.f32 %v1061_v61, %v988_v60 }
  0xfa   : > { %v1303_v63 = vpop.f32.mrf.mxu0 }
  0xfb   : > { %v1134_v0 = vadd.f32 %v1133_v55, %v1062_v62 }
  0xfd   : > { %1142 = vst [vmem:[%s189_s8 + $0x10] sm:$0xff] %v1134_v0 }
  0xfe   : > { %1381 = shalt.err (!%p1378_p5)
}
  0xff   : > { %s1382_s28 = scalar_lea.hbm %s1158_s23, 384  ;;  %s1386_s3 = scalar_lea.hbm %s1602_s2, 768 }
 0x100   : > { %p1383_p6 = scmp.ne.s32.totalorder %s1158_s23, %s1382_s28  ;;  %p1387_p10 = scmp.lt.s32.totalorder %s1158_s23, %s1602_s2 }
 0x101   : > { %p1388_p11 = scmp.lt.s32.totalorder %s1386_s3, %s1382_s28 }
 0x102   : > { %p1384_p7 = pnand %p1383_p6, %p1504_p4 }
 0x103   : > { %p1389_p12 = por %p1388_p11, %p1387_p10 }
 0x104   : > { %p1385_p9 = pneg %p1384_p7 }
 0x106   : > { %p1390_p13 = pnand %p1389_p12, %p1385_p9 }
 0x108   : > { %1393 = shalt.err (!%p1390_p13)
}
 0x109   : > { %1311 = dma.vmem_to_hbm [thread:$0]  (%p1504_p4), %s1161_s16, 384, %s1158_s23, %s1144_s24  }
 0x10a PF: > { %p1317_p0 = scmp.ge.s32.totalorder %s1444_s14, 2  ;;  %s1172_s6 = sand.u32 1, %s1424_s9  }
 0x10b   : > { %s1173_s7 = scalar_lea.sflag [#allocation3], %s1172_s6 }
 0x10c   : > { %p1314_p1 = pnand %p1317_p0, %p1511_p8 }
 0x10e   : > { %p1315_p2 = pneg %p1314_p1 }
 0x110   : > { %1419 = dma.done.wait (%p1315_p2), %s1173_s7, 384  }
 0x111   : > { %1421 = vsyncadd (%p1315_p2), %s1173_s7, 4294966912  ;;  %s15_s14 = sadd.s32 1, %s1444_s14   ;;  %s1605_s9 = smov %s1428_s10 }
 0x112   : > { %p12_p3 = scmp.ge.s32.totalorder %s15_s14, 4   ;;  %s1606_s10 = smov %s1432_s11 }
 0x113   : > { %s1607_s11 = smov %s1517_s22  ;;  %s1608_s12 = smov %s1440_s13 }
 0x114   : > { %s1609_s13 = smov %s1611_s17  ;;  %14 = sbr.rel (!%p12_p3) target bundleno = 4 (0x4), region = 70 }
 0x119   :  { %1178 = vsyncpa [#allocation3], 1 }
 0x11a   :  { %1180 = vsyncpa [#allocation3 + $0x1], 1 }

</bundles_post_ra>
